<compile_context>
chip_gen: v5e
topology: v5e:2x2
jax: 0.10.0
libtpu: 0.0.40
codegen_flags: <defaults>
</compile_context>

<pallas_src>
import numpy as np

import jax
import jax.numpy as jnp
from jax import lax
from jax.experimental import pallas as pl
from jax.experimental.pallas import tpu as pltpu


# ---------------------------------------------------------------------------
# Static pooling matrix (PyTorch adaptive window: [floor(i*L/O), ceil((i+1)*L/O)) )
# ---------------------------------------------------------------------------
def _window(i, in_size, out_size):
    start = (i * in_size) // out_size
    end = ((i + 1) * in_size + out_size - 1) // out_size
    return start, end


def _pool_matrix_np(in_size, out_size):
    P = np.zeros((out_size, in_size), dtype=np.float32)
    for i in range(out_size):
        s, e = _window(i, in_size, out_size)
        P[i, s:e] = 1.0 / (e - s)
    return P


def _round_up(n, m):
    return ((n + m - 1) // m) * m


def _vmem_capacity_bytes():
    try:
        return int(pltpu.get_tpu_info().vmem_capacity_bytes)
    except Exception:
        return 64 << 20  # conservative default (v7x per-TensorCore VMEM)


# ---------------------------------------------------------------------------
# Kernel: for each (batch block, lane block), accumulate P @ x over L blocks.
# ---------------------------------------------------------------------------
def _pool_matmul_kernel(p_ref, x_ref, o_ref, acc_ref):
    # p_ref:   (out_len, l_tile)          pooling weights for this L block
    # x_ref:   (b_tile, l_tile, c_tile)   input block
    # o_ref:   (b_tile, out_len, c_tile)  output block (written on last L step)
    # acc_ref: (b_tile, out_len, c_tile)  f32 accumulator (VMEM scratch)
    l_idx = pl.program_id(2)

    @pl.when(l_idx == 0)
    def _init():
        acc_ref[...] = jnp.zeros_like(acc_ref)

    p = p_ref[...]
    b_tile = acc_ref.shape[0]

    def body(b, carry):
        acc_ref[b] = acc_ref[b] + jnp.dot(
            p, x_ref[b], preferred_element_type=jnp.float32)
        return carry

    lax.fori_loop(0, b_tile, body, 0, unroll=True)

    @pl.when(l_idx == pl.num_programs(2) - 1)
    def _finalize():
        o_ref[...] = acc_ref[...].astype(o_ref.dtype)


# ---------------------------------------------------------------------------
# Tiling heuristics (VMEM-budget driven, no exact-divisor constraints)
# ---------------------------------------------------------------------------
def _choose_c_tile(C, max_tile=1024):
    """Largest lane tile (multiple of 128, <= max_tile) with small pad waste."""
    c_pad0 = _round_up(C, 128)
    top = min(c_pad0, max_tile)
    c_tile = 128
    for cand in range(128, top + 1, 128):
        waste = _round_up(c_pad0, cand) - c_pad0
        if waste <= max(128, c_pad0 // 8):
            c_tile = cand
    return c_tile, _round_up(c_pad0, c_tile)


def _choose_b_tile(B, fits, cap=16):
    """Largest batch block (<= cap) within budget with small pad waste."""
    best = 1
    for b in range(1, max(1, min(B, cap)) + 1):
        waste = _round_up(B, b) - B
        if waste <= max(1, B // 8) and fits(b):
            best = b
    return best


# ---------------------------------------------------------------------------
# Core driver: pool axis 1 of x_flat [B, L, C] with pooling matrix [out_len, L]
# ---------------------------------------------------------------------------
def _adaptive_pool_core(x_flat, pool_mat_np):
    B, L, C = x_flat.shape
    out_len = int(pool_mat_np.shape[0])
    x_dtype = x_flat.dtype
    db = jnp.dtype(x_dtype).itemsize
    p_dtype = x_dtype if jnp.issubdtype(x_dtype, jnp.floating) else jnp.float32
    p_db = jnp.dtype(p_dtype).itemsize

    vmem_cap = _vmem_capacity_bytes()
    budget = int(vmem_cap * 0.55)   # target for 2x(in+out) double-buffer + P + acc

    c_tile, c_pad = _choose_c_tile(C)

    def fits(b, lt):
        x_blk = b * lt * c_tile * db
        o_blk = b * out_len * c_tile * db
        p_blk = out_len * lt * p_db
        acc = b * out_len * c_tile * 4
        return 2 * (x_blk + o_blk) + 2 * p_blk + acc + (2 << 20) <= budget

    # Pooled-extent (reduction) tiling: whole L per step when it fits,
    # otherwise the largest multiple of 128 that does.
    if fits(1, L):
        l_tile, L_pad = L, L
    else:
        l_tile = 128
        for cand in range(128, _round_up(L, 128) + 1, 128):
            if fits(1, cand):
                l_tile = cand
        L_pad = _round_up(L, l_tile)

    b_tile = _choose_b_tile(B, lambda b: fits(b, l_tile))
    B_pad = _round_up(B, b_tile)

    # Keep >=2 steps along a "parallel" axis so megacore (v7x) can shard.
    if B_pad // b_tile == 1 and c_pad // c_tile == 1 and B >= 2:
        b_tile = (B + 1) // 2
        B_pad = _round_up(B, b_tile)

    # Zero-pad input; padded P columns are zero so padded rows contribute 0.
    pads = ((0, B_pad - B), (0, L_pad - L), (0, c_pad - C))
    if any(p[1] for p in pads):
        x_flat = jnp.pad(x_flat, pads)

    P_np = np.zeros((out_len, L_pad), dtype=np.float32)
    P_np[:, :L] = pool_mat_np
    P = jnp.asarray(P_np, dtype=p_dtype)

    grid = (B_pad // b_tile, c_pad // c_tile, L_pad // l_tile)

    flops = int(2 * B_pad * out_len * L_pad * c_pad)
    bytes_accessed = int(
        (B_pad * L_pad * c_pad + B_pad * out_len * c_pad) * db
        + out_len * L_pad * p_db)

    # ~96 MiB on v5e/v6e (128 MiB physical), ~48 MiB on v7x (64 MiB physical).
    vmem_limit = int(vmem_cap * 3 // 4)

    # TODO(synk): when per-step compute is tiny vs DMA (small out_len, short L),
    # add pipeline_mode=pl.Buffered(3) on the x BlockSpec for deeper prefetch.
    out = pl.pallas_call(
        _pool_matmul_kernel,
        out_shape=jax.ShapeDtypeStruct((B_pad, out_len, c_pad), x_dtype),
        grid_spec=pltpu.PrefetchScalarGridSpec(
            num_scalar_prefetch=0,
            grid=grid,
            in_specs=[
                pl.BlockSpec((out_len, l_tile), lambda i, c, l: (0, l)),
                pl.BlockSpec((b_tile, l_tile, c_tile), lambda i, c, l: (i, l, c)),
            ],
            out_specs=pl.BlockSpec((b_tile, out_len, c_tile),
                                   lambda i, c, l: (i, 0, c)),
            scratch_shapes=[pltpu.VMEM((b_tile, out_len, c_tile), jnp.float32)],
        ),
        compiler_params=pltpu.CompilerParams(
            dimension_semantics=("parallel", "parallel", "arbitrary"),
            vmem_limit_bytes=vmem_limit,
        ),
        cost_estimate=pl.CostEstimate(
            flops=flops, transcendentals=0, bytes_accessed=bytes_accessed),
    )(P, x_flat)

    return out[:B, :, :C]


# ---------------------------------------------------------------------------
# Public pooling entry points
# ---------------------------------------------------------------------------
def adaptive_avg_pool1d(x, output_size):
    """x: [B, T, C] -> [B, output_size, C] (adaptive average over T)."""
    B, T, C = x.shape
    return _adaptive_pool_core(x, _pool_matrix_np(T, int(output_size)))


def adaptive_avg_pool2d(x, output_size):
    """x: [B, H, W, C] -> [B, oh, ow, C]; separable W-then-H pooling."""
    B, H, W, C = x.shape
    oh, ow = int(output_size[0]), int(output_size[1])
    y = _adaptive_pool_core(x.reshape(B * H, W, C), _pool_matrix_np(W, ow))
    y = _adaptive_pool_core(y.reshape(B, H, ow * C), _pool_matrix_np(H, oh))
    return y.reshape(B, oh, ow, C)


# ---------------------------------------------------------------------------
# Module-equivalent wrapper
# ---------------------------------------------------------------------------
class AdaptivePool:
    """JAX/Pallas port of speechbrain.nnet.pooling.AdaptivePool (no parameters)."""

    def __init__(self, output_size):
        condition = isinstance(output_size, (int, tuple, list))
        assert condition, "output size must be int, list or tuple"
        if isinstance(output_size, (tuple, list)):
            assert len(output_size) == 2, "len of output size must not be greater than 2"
        self.output_size = output_size

    def __call__(self, x):
        if x.ndim == 3:
            assert isinstance(self.output_size, int)
            return adaptive_avg_pool1d(x, self.output_size)
        if x.ndim == 4:
            osz = self.output_size
            if isinstance(osz, int):
                osz = (osz, osz)
            return adaptive_avg_pool2d(x, tuple(osz))
        raise ValueError("AdaptivePool expects a 3-D or 4-D input")


# ---------------------------------------------------------------------------
# Pure-JAX references (same adaptive-window formula as PyTorch)
# ---------------------------------------------------------------------------
def _ref_pool1d(x, out_size):
    B, T, C = x.shape
    rows = []
    for i in range(out_size):
        s, e = _window(i, T, out_size)
        rows.append(jnp.mean(x[:, s:e, :], axis=1, keepdims=True))
    return jnp.concatenate(rows, axis=1)


def _ref_pool2d(x, out_hw):
    B, H, W, C = x.shape
    oh, ow = out_hw
    rows = []
    for i in range(oh):
        hs, he = _window(i, H, oh)
        cols = []
        for j in range(ow):
            ws, we = _window(j, W, ow)
            cols.append(jnp.mean(x[:, hs:he, ws:we, :], axis=(1, 2), keepdims=True))
        rows.append(jnp.concatenate(cols, axis=2))
    return jnp.concatenate(rows, axis=1)


if __name__ == "__main__":
    key = jax.random.PRNGKey(0)
    k3, k4, k5, k6 = jax.random.split(key, 4)

    # 3-D case: [B, T, C] = [2, 10, 40], adaptive-pool time axis to 4
    x3 = jax.random.normal(k3, (2, 10, 40), dtype=jnp.float32)
    y3 = jax.block_until_ready(AdaptivePool(4)(x3))
    ref3 = _ref_pool1d(x3, 4)
    assert y3.shape == (2, 4, 40), y3.shape
    assert jnp.allclose(y3, ref3, atol=1e-5, rtol=1e-5)

    # 4-D case: [B, H, W, C] = [2, 7, 9, 8], adaptive-pool (H, W) to (3, 4)
    x4 = jax.random.normal(k4, (2, 7, 9, 8), dtype=jnp.float32)
    y4 = jax.block_until_ready(AdaptivePool((3, 4))(x4))
    ref4 = _ref_pool2d(x4, (3, 4))
    assert y4.shape == (2, 3, 4, 8), y4.shape
    assert jnp.allclose(y4, ref4, atol=1e-5, rtol=1e-5)

    # 3-D case with lane-aligned channels (no padding path): [2, 16, 256] -> 1
    x5 = jax.random.normal(k5, (2, 16, 256), dtype=jnp.float32)
    y5 = jax.block_until_ready(AdaptivePool(1)(x5))
    ref5 = _ref_pool1d(x5, 1)
    assert y5.shape == (2, 1, 256), y5.shape
    assert jnp.allclose(y5, ref5, atol=1e-5, rtol=1e-5)

    # bf16 input exercises the dtype-matched (bf16 x bf16 -> f32) MXU path and
    # the odd-batch padding path.  Small numeric delta from bf16 1/n weights.
    x6 = jax.random.normal(k6, (3, 24, 96), dtype=jnp.float32).astype(jnp.bfloat16)
    y6 = jax.block_until_ready(AdaptivePool(5)(x6))
    ref6 = _ref_pool1d(x6.astype(jnp.float32), 5)
    assert y6.shape == (3, 5, 96), y6.shape
    assert jnp.allclose(y6.astype(jnp.float32), ref6, atol=3e-2, rtol=3e-2)

    print("KERNEL_OK")
</pallas_src>

<mosaic_0001>
module attributes {stable_mosaic.version = 11 : i64} {
  func.func @_pool_matmul_kernel(%arg0: i32, %arg1: i32, %arg2: i32, %arg3: memref<4x10xf32, #tpu.memory_space<vmem>>, %arg4: memref<1x10x128xf32, #tpu.memory_space<vmem>>, %arg5: memref<1x4x128xf32, #tpu.memory_space<vmem>>, %arg6: memref<1x4x128xf32, #tpu.memory_space<vmem>>) attributes {dimension_semantics = [#tpu.dimension_semantics<parallel>, #tpu.dimension_semantics<parallel>, #tpu.dimension_semantics<arbitrary>], iteration_bounds = array<i64: 2, 1, 1>, scalar_prefetch = 0 : i64, scratch_operands = 1 : i64, tpu.core_type = #tpu.core_type<tc>, window_params = [{transform_indices = @transform_0, window_bounds = array<i64: 4, 10>}, {transform_indices = @transform_1, window_bounds = array<i64: 1, 10, 128>}, {transform_indices = @transform_2, window_bounds = array<i64: 1, 4, 128>}]} {
    %c0_i32 = arith.constant 0 : i32
    %0 = arith.cmpi eq, %arg2, %c0_i32 : i32
    %1 = arith.extui %0 : i1 to i32
    %c0_i32_0 = arith.constant 0 : i32
    %2 = arith.cmpi ne, %1, %c0_i32_0 : i32
    scf.if %2 {
      %cst_11 = arith.constant 0.000000e+00 : f32
      %19 = vector.broadcast %cst_11 : f32 to vector<1x4x128xf32>
      %c0_12 = arith.constant 0 : index
      %c0_13 = arith.constant 0 : index
      %c0_14 = arith.constant 0 : index
      %20 = vector.load %arg6[%c0_12, %c0_13, %c0_14] : memref<1x4x128xf32, #tpu.memory_space<vmem>>, vector<1x4x128xf32>
      tpu.vector_store %arg6[%c0_12, %c0_13, %c0_14], %19 {strides = array<i32>} : memref<1x4x128xf32, #tpu.memory_space<vmem>>, vector<1x4x128xf32>,
    } else {
    }
    %c0 = arith.constant 0 : index
    %c0_1 = arith.constant 0 : index
    %3 = vector.load %arg3[%c0, %c0_1] : memref<4x10xf32, #tpu.memory_space<vmem>>, vector<4x10xf32>
    %c0_i32_2 = arith.constant 0 : i32
    %4 = arith.index_cast %c0_i32_2 : i32 to index
    %c0_3 = arith.constant 0 : index
    %c0_4 = arith.constant 0 : index
    %5 = vector.load %arg6[%4, %c0_3, %c0_4] : memref<1x4x128xf32, #tpu.memory_space<vmem>>, vector<1x4x128xf32>
    %6 = vector.shape_cast %5 : vector<1x4x128xf32> to vector<4x128xf32>
    %7 = arith.index_cast %c0_i32_2 : i32 to index
    %c0_5 = arith.constant 0 : index
    %c0_6 = arith.constant 0 : index
    %8 = vector.load %arg4[%7, %c0_5, %c0_6] : memref<1x10x128xf32, #tpu.memory_space<vmem>>, vector<1x10x128xf32>
    %9 = vector.shape_cast %8 : vector<1x10x128xf32> to vector<10x128xf32>
    %cst = arith.constant dense<0.000000e+00> : vector<4x128xf32>
    %10 = tpu.matmul %3, %9, %cst {dimension_numbers = #tpu.dot_dimension_numbers<[1], [0], [0], [1], [0, 0, 1, 1], [], []>} : vector<4x10xf32>, vector<10x128xf32>, vector<4x128xf32> -> vector<4x128xf32>
    %11 = arith.addf %6, %10 : vector<4x128xf32>
    %12 = arith.index_cast %c0_i32_2 : i32 to index
    %c0_7 = arith.constant 0 : index
    %c0_8 = arith.constant 0 : index
    %13 = vector.load %arg6[%12, %c0_7, %c0_8] : memref<1x4x128xf32, #tpu.memory_space<vmem>>, vector<1x4x128xf32>
    %14 = vector.shape_cast %13 : vector<1x4x128xf32> to vector<4x128xf32>
    %15 = vector.shape_cast %11 : vector<4x128xf32> to vector<1x4x128xf32>
    tpu.vector_store %arg6[%12, %c0_7, %c0_8], %15 {strides = array<i32>} : memref<1x4x128xf32, #tpu.memory_space<vmem>>, vector<1x4x128xf32>,
    %c1_i32 = arith.constant 1 : i32
    %c0_i32_9 = arith.constant 0 : i32
    %16 = arith.cmpi eq, %arg2, %c0_i32_9 : i32
    %17 = arith.extui %16 : i1 to i32
    %c0_i32_10 = arith.constant 0 : i32
    %18 = arith.cmpi ne, %17, %c0_i32_10 : i32
    scf.if %18 {
      %c0_11 = arith.constant 0 : index
      %c0_12 = arith.constant 0 : index
      %c0_13 = arith.constant 0 : index
      %19 = vector.load %arg6[%c0_11, %c0_12, %c0_13] : memref<1x4x128xf32, #tpu.memory_space<vmem>>, vector<1x4x128xf32>
      %c0_14 = arith.constant 0 : index
      %c0_15 = arith.constant 0 : index
      %c0_16 = arith.constant 0 : index
      %20 = vector.load %arg5[%c0_14, %c0_15, %c0_16] : memref<1x4x128xf32, #tpu.memory_space<vmem>>, vector<1x4x128xf32>
      tpu.vector_store %arg5[%c0_14, %c0_15, %c0_16], %19 {strides = array<i32>} : memref<1x4x128xf32, #tpu.memory_space<vmem>>, vector<1x4x128xf32>,
    } else {
    }
    return
  }
  func.func @transform_0(%arg0: i32, %arg1: i32, %arg2: i32) -> (i32, i32) {
    %c0_i32 = arith.constant 0 : i32
    %c0_i32_0 = arith.constant 0 : i32
    return %c0_i32, %arg2 : i32, i32
  }
  func.func @transform_1(%arg0: i32, %arg1: i32, %arg2: i32) -> (i32, i32, i32) {
    %c0_i32 = arith.constant 0 : i32
    return %arg0, %arg2, %arg1 : i32, i32, i32
  }
  func.func @transform_2(%arg0: i32, %arg1: i32, %arg2: i32) -> (i32, i32, i32) {
    %c0_i32 = arith.constant 0 : i32
    %c0_i32_0 = arith.constant 0 : i32
    return %arg0, %c0_i32, %arg1 : i32, i32, i32
  }
}

</mosaic_0001>

<bundles_post_ra>
// kernel: tpu_custom_call.1
= control target key start
LH: loop header
LB: loop body
LE: loop exit
PB: predicated region body
PF: predicated region fallthrough
CT: control target
= control target key end

     0   :  { %7 = vsyncpa [#allocation4], 0  ;;  %s631_s0 = inlined_call_operand.vmem [shape: f32[4,10], index: 0, kind: input, shape index: {}]   ;;  %s632_s1 = inlined_call_operand.vmem [shape: f32[2,10,128], index: 1, kind: input, shape index: {}]   ;;  %s633_s2 = inlined_call_operand.hbm [shape: f32[2,4,128], index: 2, kind: output, shape index: {}]  }
   0x1   :  { %9 = vsyncpa [#allocation4 + $0x1], 0  ;;  %s531_s9 = smov 0   ;;  %s533_s10 = smov 0  }
   0x2   :  { %s535_s11 = smov 0   ;;  %s537_s12 = smov 0  }
   0x3   :  { %s539_s13 = smov 0   ;;  %s541_s14 = smov 0  }
   0x4 LB: > { %s363_s15 = sadd.s32 4294967295, %s513_s14   ;;  %s364_s16 = sadd.s32 4294967294, %s513_s14   ;;  %s513_s14 = sphi %s541_s14, %s15_s14   ;;  %s509_s13 = sphi %s539_s13, %s640_s13   ;;  %s505_s12 = sphi %s537_s12, %s639_s12   ;;  %s501_s11 = sphi %s535_s11, %s638_s11   ;;  %s497_s10 = sphi %s533_s10, %s637_s10   ;;  %s493_s9 = sphi %s531_s9, %s636_s9  }
   0x5   : > { %s34_s17 = sadd.s32 1, %s509_s13  ;;  %s99_s18 = sadd.s32 1, %s501_s11 }
   0x6   : > { %p36_p0 = scmp.ge.s32.totalorder %s34_s17, 2  ;;  %p109_p1 = scmp.ne.s32.totalorder %s501_s11, %s497_s10 }
   0x7   : > { %p110_p2 = scmp.eq.s32.totalorder %s363_s15, 1  ;;  %p115_p3 = scmp.ne.s32.totalorder %s497_s10, %s493_s9 }
   0x8   : > { %s642_s17 = smov (%p36_p0, %s34_s17), 0  ;;  %p116_p5 = scmp.eq.s32.totalorder %s364_s16, 1 }
   0x9   : > { %p571_p4 = por %p110_p2, %p109_p1  ;;  %s94_s20 = ssub.s32 %s509_s13, %s642_s17 }
   0xa   : > { %p368_p6 = scmp.ge.s32.totalorder %s513_s14, 1  ;;  %p97_p7 = scmp.eq.s32.totalorder %s94_s20, 0 }
   0xb   : > { %p578_p8 = por %p116_p5, %p115_p3  ;;  %p157_p9 = scmp.lt.s32.totalorder %s513_s14, 3 }
   0xc   : > { %s584_s22 = scalar_select %p97_p7, %s501_s11, %s99_s18  }
   0xd   : > { %p158_p10 = pnand %p368_p6, %p157_p9 }
   0xe   : > { %p195_p11 = scmp.lt.s32.totalorder (!%p158_p10), %s505_s12, 1  ;;  %s187_s30 = sand.u32 (!%p158_p10), 1, %s497_s10  }
   0xf   : > { %161 = sbr.rel (%p158_p10) target bundleno = 167 (0xa7), region = 28  ;;  %s369_s3 = sshll.u32 (!%p158_p10), %s187_s30, 2 }
  0x10   : > { %s375_s4 = sshll.u32 (!%p158_p10), %s505_s12, 2  ;;  %s189_s8 = scalar_lea.vmem (!%p158_p10), [#allocation3], %s369_s3 }
  0x11   : > { %s263_s7 = scalar_lea.hbm (!%p158_p10), %s633_s2, %s375_s4  ;;  %s265_s15 = sshll.u32 (!%p158_p10), %s189_s8, 4  ;;  %s266_s15 = int_to_ptr.vmem [resolvable:$true] %s265_s15 }
  0x12   : > { %s267_s16 = sshll.u32 (!%p158_p10), %s263_s7, 4  ;;  %s252_s18 = scalar_lea.sflag (!%p158_p10), [#allocation4], %s187_s30  ;;  %s268_s16 = int_to_ptr.hbm [resolvable:$true] %s267_s16 }
  0x13   : > { %s449_s20 = sshra.s32 (!%p158_p10), %s268_s16, 4  ;;  %s455_s25 = scalar_lea.hbm (!%p158_p10), %s633_s2, 8  ;;  %s450_s20 = int_to_ptr.hbm [resolvable:$true] %s449_s20 }
  0x14   : > { %v515_v0 = vmov 0.0   ;;  %s196_s23 = scalar_select %p195_p11, %s505_s12, 1  ;;  %vm220_vm0 = vcmask 1041408   ;;  %v212_v3 = vld [vmem:[%s631_s0] sm:$0xf]  ;;  %vm216_vm1 = vcmask 80896  }
  0x15   : > { %211 = vst [vmem:[#allocation2] sm:$0xf] %v515_v0  ;;  %p456_p1 = scmp.lt.s32.totalorder %s450_s20, %s633_s2 }
  0x16   : > { %s378_s24 = sshll.u32 %s196_s23, 4  ;;  %s451_s23 = scalar_lea.hbm %s450_s20, 4 }
  0x17   : > { %s205_s27 = scalar_lea.vmem %s632_s1, %s378_s24  ;;  %p452_p12 = scmp.ne.s32.totalorder %s450_s20, %s451_s23 }
  0x18   : > { %v215_v1 = vld [vmem:[%s205_s27 + $0x8] sm:$0x3]  ;;  %v214_v2 = vld [vmem:[%s205_s27] sm:$0xff]  ;;  %p457_p2 = scmp.lt.s32.totalorder %s455_s25, %s451_s23 }
  0x19   : > { %372 = vmatpush.msk.msra.mxu0 %vm220_vm0, %v215_v1  ;;  %p453_p13 = pnand %p452_p12, %p571_p4 }
  0x1a   : > { %p458_p3 = por %p457_p2, %p456_p1 }
  0x1b   : > { %239 = vmatpush.msra.mxu0 %v214_v2  ;;  %p454_p0 = pneg %p453_p13 }
  0x1c   : > { %373 = vmatmul.msk.f32.vlgmr.msra.gmra.mxu0 %vm216_vm1, %v212_v3  ;;  %v213_v4 = vld [vmem:[#allocation2] sm:$0xf] }
  0x1d   : > { %p459_p5 = pnand %p458_p3, %p454_p0 }
  0x99   : > { %v241_v5 = vpop.f32.mrf.mxu0 }
  0x9a   : > { %v244_v6 = vadd.f32 %v241_v5, %v213_v4 }
  0x9c   : > { %245 = vst [vmem:[#allocation2] sm:$0xf] %v244_v6 }
  0xa3   : > { %v249_v7 = vld [vmem:[#allocation2] sm:$0xf] }
  0xa4   : > { %250 = vst [vmem:[%s189_s8] sm:$0xf] %v249_v7 }
  0xa5   : > { %462 = shalt.err (!%p459_p5)
}
  0xa6   : > { %379 = dma.vmem_to_hbm [thread:$0]  (%p571_p4), %s266_s15, 64, %s268_s16, %s252_s18  }
  0xa7 PF: > { %p385_p6 = scmp.ge.s32.totalorder %s513_s14, 2  ;;  %s279_s28 = sand.u32 1, %s493_s9  }
  0xa8   : > { %s280_s29 = scalar_lea.sflag [#allocation4], %s279_s28 }
  0xa9   : > { %p382_p7 = pnand %p385_p6, %p578_p8 }
  0xab   : > { %p383_p9 = pneg %p382_p7 }
  0xad   : > { %488 = dma.done.wait (%p383_p9), %s280_s29, 64  }
  0xae   : > { %490 = vsyncadd (%p383_p9), %s280_s29, 4294967232  ;;  %s15_s14 = sadd.s32 1, %s513_s14   ;;  %s636_s9 = smov %s497_s10 }
  0xaf   : > { %p12_p10 = scmp.ge.s32.totalorder %s15_s14, 4   ;;  %s637_s10 = smov %s501_s11 }
  0xb0   : > { %s638_s11 = smov %s584_s22  ;;  %s639_s12 = smov %s509_s13 }
  0xb1   : > { %s640_s13 = smov %s642_s17  ;;  %14 = sbr.rel (!%p12_p10) target bundleno = 4 (0x4), region = 74 }
  0xb6   :  { %286 = vsyncpa [#allocation4], 1 }
  0xb7   :  { %288 = vsyncpa [#allocation4 + $0x1], 1 }

</bundles_post_ra>
